<compile_context>
chip_gen: v6e
topology: v6e:2x2x1
jax: 0.10.0
libtpu: 0.0.40
codegen_flags: <defaults>
</compile_context>

<pallas_src>
import functools

import jax
import jax.numpy as jnp
from jax.experimental import pallas as pl
from jax.experimental.pallas import tpu as pltpu


def _round_up(x, m):
    return ((x + m - 1) // m) * m


def _cdiv(a, b):
    return -(-a // b)


def _choose_grid(n_rows, target_rows=2048, row_align=16):
    """Block size ~= N / n_blocks (tiny padding), capped at target_rows; keep >=2
    (even) blocks for large N so a v7x chip can shard the 'parallel' axis on both TCs."""
    n_blocks = max(1, _cdiv(n_rows, target_rows))
    if n_rows >= 1024:
        n_blocks = max(2, n_blocks)
        if n_blocks % 2:
            n_blocks += 1
    block_rows = _round_up(_cdiv(n_rows, n_blocks), row_align)
    return n_blocks, block_rows


# ---------------------------------------------------------------------------
# Kernel
# ---------------------------------------------------------------------------
def decoder_gru_kernel(n_layers, input_size, hidden_size, output_size,
                       pk_ref, w0_ref, b0_ref, wrx_ref, wrh_ref, br_ref,
                       wo_ref, bo_ref, wmid_ref, slab_ref):
    """Embed(folded) -> stacked GRUCells -> fused lane-dense output head."""
    H, I, O, L = hidden_size, input_size, output_size, n_layers

    def gru_step(g, h_prev):
        # g columns: [ r | z | n_input_part | n_hidden_part ]  (4H total)
        rz = jax.nn.sigmoid(g[:, 0:2 * H])          # one EUP pass for r and z
        r, z = rz[:, 0:H], rz[:, H:2 * H]
        n = jnp.tanh(g[:, 2 * H:3 * H] + r * g[:, 3 * H:4 * H])
        return (1.0 - z) * n + z * h_prev

    pk = pk_ref[...]                                 # (R, I + L*H) bf16, single stream

    # ----- layer 0: embed Linear folded into w0; K spans the whole packed row
    #       (rows for other layers' h0 are zero in w0) -----
    g = jnp.dot(pk, w0_ref[...], preferred_element_type=jnp.float32) + b0_ref[...]
    h = gru_step(g, pk[:, I:I + H].astype(jnp.float32))

    # ----- layers 1..L-1 (static unroll), two accumulated dots per layer -----
    hidden_mid = []                                  # hiddens of layers 0..L-2 (f32)
    for i in range(1, L):
        h_prev = pk[:, I + i * H: I + (i + 1) * H]   # bf16 slice of the packed stream
        g = (jnp.dot(h.astype(pk.dtype), wrx_ref[i - 1],
                     preferred_element_type=jnp.float32)
             + jnp.dot(h_prev, wrh_ref[i - 1],
                       preferred_element_type=jnp.float32)
             + br_ref[i - 1])
        hidden_mid.append(h)
        h = gru_step(g, h_prev.astype(jnp.float32))

    # ----- fused lane-dense head -----
    # lanes [0,O)        = output Linear of h_last
    # lanes [O,O+H)      = h_last (identity block in wo)
    # lanes [O+H,O+L*H)  = hiddens of layers 0..L-2 (identity blocks in wmid)
    slab = (jnp.dot(h.astype(pk.dtype), wo_ref[...],
                    preferred_element_type=jnp.float32) + bo_ref[...])
    for i, h_i in enumerate(hidden_mid):
        slab = slab + jnp.dot(h_i.astype(pk.dtype), wmid_ref[i],
                              preferred_element_type=jnp.float32)
    slab_ref[...] = slab.astype(slab_ref.dtype)      # one unmasked 128-lane store


# ---------------------------------------------------------------------------
# Weight packing (offline, pure JAX)
# ---------------------------------------------------------------------------
def pack_params(raw, *, input_size, output_size, hidden_size, n_layers):
    H, I, O, L = hidden_size, input_size, output_size, n_layers
    K0 = I + L * H
    slab_w = _round_up(O + L * H, 128)
    hp = jax.lax.Precision.HIGHEST
    bf = jnp.bfloat16

    def pack_x_side(w_i):
        # input-side gate weight (in_dim, 3H), gate order (r,z,n) like torch.nn.GRUCell
        wx = jnp.zeros((w_i.shape[0], 4 * H), jnp.float32)
        return wx.at[:, 0:3 * H].set(w_i)            # n_hidden columns stay 0

    def pack_h_side(w_h):
        wh = jnp.zeros((H, 4 * H), jnp.float32)
        wh = wh.at[:, 0:2 * H].set(w_h[:, 0:2 * H])
        return wh.at[:, 3 * H:4 * H].set(w_h[:, 2 * H:3 * H])   # n_input columns stay 0

    def pack_bias(b_i, b_h):
        return jnp.concatenate([b_i[:, 0:2 * H] + b_h[:, 0:2 * H],
                                b_i[:, 2 * H:3 * H],
                                b_h[:, 2 * H:3 * H]], axis=1)   # (1, 4H)

    # layer 0: fold embed Linear into input-side gate weight / bias (math-exact)
    w_i0 = jnp.dot(raw["embed_w"], raw["w_ih"][0], precision=hp)            # (I, 3H)
    b_i0 = jnp.dot(raw["embed_b"], raw["w_ih"][0], precision=hp) + raw["b_ih"][0]
    w0 = jnp.zeros((K0, 4 * H), jnp.float32)
    w0 = w0.at[0:I].set(pack_x_side(w_i0))
    w0 = w0.at[I:I + H].set(pack_h_side(raw["w_hh"][0]))   # other layers' h0 rows = 0
    b0 = pack_bias(b_i0, raw["b_hh"][0])

    n_rest = max(L - 1, 1)
    wrx = jnp.zeros((n_rest, H, 4 * H), jnp.float32)
    wrh = jnp.zeros((n_rest, H, 4 * H), jnp.float32)
    br = jnp.zeros((n_rest, 1, 4 * H), jnp.float32)
    for i in range(1, L):
        wrx = wrx.at[i - 1].set(pack_x_side(raw["w_ih"][i]))
        wrh = wrh.at[i - 1].set(pack_h_side(raw["w_hh"][i]))
        br = br.at[i - 1].set(pack_bias(raw["b_ih"][i], raw["b_hh"][i]))

    # fused head: [ output Linear | identity (emit h_last) | zero pad ]
    wo = jnp.zeros((H, slab_w), jnp.float32)
    wo = wo.at[:, 0:O].set(raw["out_w"])
    wo = wo.at[:, O:O + H].set(jnp.eye(H, dtype=jnp.float32))
    bo = jnp.zeros((1, slab_w), jnp.float32)
    bo = bo.at[:, 0:O].set(raw["out_b"])

    # identity blocks that place intermediate-layer hiddens in the spare slab lanes
    wmid = jnp.zeros((n_rest, H, slab_w), jnp.float32)
    for i in range(L - 1):
        wmid = wmid.at[i, :, O + H + i * H: O + H + (i + 1) * H].set(
            jnp.eye(H, dtype=jnp.float32))

    return {"w0": w0.astype(bf), "b0": b0,
            "wrx": wrx.astype(bf), "wrh": wrh.astype(bf), "br": br,
            "wo": wo.astype(bf), "bo": bo, "wmid": wmid.astype(bf),
            "slab_w": slab_w}


# ---------------------------------------------------------------------------
# Wrapper
# ---------------------------------------------------------------------------
def decoder_gru_forward(x, h0, packed, *, input_size, output_size, hidden_size,
                        n_layers, target_rows=2048):
    """Returns (output, hiddens) with hiddens shaped (n_layers, N, H); hiddens[-1]
    is the h_in the PyTorch module returns, hiddens[i] are the self.hidden[i] updates."""
    N = x.shape[0]
    H, I, O, L = hidden_size, input_size, output_size, n_layers
    slab_w = packed["slab_w"]

    n_blocks, block_rows = _choose_grid(N, target_rows)
    n_pad = n_blocks * block_rows

    # one contiguous bf16 per-row stream: [ x | h0_layer0 | ... | h0_layer{L-1} ]
    pk = jnp.concatenate(
        [x, jnp.transpose(h0, (1, 0, 2)).reshape(N, L * H)], axis=1).astype(jnp.bfloat16)
    if n_pad != N:
        pk = jnp.pad(pk, ((0, n_pad - N), (0, 0)))

    kernel = functools.partial(decoder_gru_kernel, n_layers, input_size,
                               hidden_size, output_size)

    def resident(arr):  # weights stay pinned: constant block index across the grid
        nd = arr.ndim
        return pl.BlockSpec(arr.shape, lambda i, nd=nd: (0,) * nd)

    slab = pl.pallas_call(
        kernel,
        out_shape=jax.ShapeDtypeStruct((n_pad, slab_w), jnp.bfloat16),
        grid=(n_blocks,),
        in_specs=[
            pl.BlockSpec((block_rows, I + L * H), lambda i: (i, 0)),  # packed rows
            resident(packed["w0"]), resident(packed["b0"]),
            resident(packed["wrx"]), resident(packed["wrh"]), resident(packed["br"]),
            resident(packed["wo"]), resident(packed["bo"]), resident(packed["wmid"]),
        ],
        out_specs=pl.BlockSpec((block_rows, slab_w), lambda i: (i, 0)),
        compiler_params=pltpu.CompilerParams(
            dimension_semantics=("parallel",),
            vmem_limit_bytes=48 * 1024 * 1024),
    )(pk, packed["w0"], packed["b0"], packed["wrx"], packed["wrh"], packed["br"],
      packed["wo"], packed["bo"], packed["wmid"])

    out = slab[:N, 0:O]
    h_last = slab[:N, O:O + H]
    if L > 1:
        h_mid = slab[:N, O + H: O + L * H].reshape(N, L - 1, H)   # layers 0..L-2
        hiddens = jnp.concatenate([h_mid, h_last[:, None, :]], axis=1)
    else:
        hiddens = h_last[:, None, :]
    hiddens = jnp.transpose(hiddens, (1, 0, 2))                   # (L, N, H)
    return out, hiddens


# ---------------------------------------------------------------------------
# Reference (pure JAX f32, follows the PyTorch module exactly) + demo
# ---------------------------------------------------------------------------
def _init_params(key, input_size, output_size, hidden_size, n_layers):
    """Deterministic synthetic params, PyTorch-style uniform(-1/sqrt(fan_in), 1/sqrt(fan_in)).
    Linear/GRUCell weights stored pre-transposed as (in_features, out_features);
    GRU gate order along the 3H axis is (r, z, n), matching torch.nn.GRUCell."""
    def lin(k, fan_in, shape):
        bound = 1.0 / jnp.sqrt(jnp.float32(fan_in))
        return jax.random.uniform(k, shape, jnp.float32, -bound, bound)

    keys = jax.random.split(key, 4 + 4 * n_layers)
    p = {}
    p["embed_w"] = lin(keys[0], input_size, (input_size, hidden_size))
    p["embed_b"] = lin(keys[1], input_size, (1, hidden_size))
    w_ih, w_hh, b_ih, b_hh = [], [], [], []
    for i in range(n_layers):
        k0, k1, k2, k3 = keys[2 + 4 * i: 6 + 4 * i]
        w_ih.append(lin(k0, hidden_size, (hidden_size, 3 * hidden_size)))
        w_hh.append(lin(k1, hidden_size, (hidden_size, 3 * hidden_size)))
        b_ih.append(lin(k2, hidden_size, (1, 3 * hidden_size)))
        b_hh.append(lin(k3, hidden_size, (1, 3 * hidden_size)))
    p["w_ih"] = jnp.stack(w_ih)
    p["w_hh"] = jnp.stack(w_hh)
    p["b_ih"] = jnp.stack(b_ih)
    p["b_hh"] = jnp.stack(b_hh)
    p["out_w"] = lin(keys[2 + 4 * n_layers], hidden_size, (hidden_size, output_size))
    p["out_b"] = lin(keys[3 + 4 * n_layers], hidden_size, (1, output_size))
    return p


def _reference_forward(x, raw, h0, n_layers, hidden_size):
    H = hidden_size
    h_in = x @ raw["embed_w"] + raw["embed_b"]
    hiddens = []
    for i in range(n_layers):
        h_prev = h0[i]
        gi = h_in @ raw["w_ih"][i] + raw["b_ih"][i]
        gh = h_prev @ raw["w_hh"][i] + raw["b_hh"][i]
        r = jax.nn.sigmoid(gi[:, :H] + gh[:, :H])
        z = jax.nn.sigmoid(gi[:, H:2 * H] + gh[:, H:2 * H])
        n = jnp.tanh(gi[:, 2 * H:] + r * gh[:, 2 * H:])
        h_in = (1.0 - z) * n + z * h_prev
        hiddens.append(h_in)
    out = h_in @ raw["out_w"] + raw["out_b"]
    return out, jnp.stack(hiddens)


if __name__ == "__main__":
    # Small shapes consistent with forward(): inputs.view(-1, input_size) -> (N, input_size)
    N = 8
    INPUT = 16
    HIDDEN = 32
    OUTPUT = 16
    LAYERS = 2

    key = jax.random.PRNGKey(0)
    k_param, k_x, k_h = jax.random.split(key, 3)

    raw = _init_params(k_param, INPUT, OUTPUT, HIDDEN, LAYERS)
    x = jax.random.normal(k_x, (N, INPUT), jnp.float32)
    # non-zero hidden state (as in decode steps > 1) to exercise the h-side gate path;
    # init_hidden()'s zeros are a special case of this.
    h0 = 0.5 * jax.random.normal(k_h, (LAYERS, N, HIDDEN), jnp.float32)

    packed = pack_params(raw, input_size=INPUT, output_size=OUTPUT,
                         hidden_size=HIDDEN, n_layers=LAYERS)

    out, hiddens = decoder_gru_forward(
        x, h0, packed, input_size=INPUT, output_size=OUTPUT,
        hidden_size=HIDDEN, n_layers=LAYERS)
    jax.block_until_ready((out, hiddens))

    # correctness check vs the pure-JAX f32 (unfused, unfolded) reference;
    # tolerance accounts for bf16 weight/activation streaming (f32 accumulation).
    out_r, hiddens_r = _reference_forward(x, raw, h0, LAYERS, HIDDEN)
    assert jnp.allclose(out.astype(jnp.float32), out_r, atol=3e-2, rtol=3e-2), \
        "output mismatch vs reference"
    assert jnp.allclose(hiddens.astype(jnp.float32), hiddens_r, atol=3e-2, rtol=3e-2), \
        "hidden-state mismatch vs reference"

    print("KERNEL_OK")
</pallas_src>

<mosaic_0001>
module attributes {stable_mosaic.version = 11 : i64} {
  func.func @decoder_gru_kernel(%arg0: i32, %arg1: memref<16x80xbf16, #tpu.memory_space<vmem>>, %arg2: memref<80x128xbf16, #tpu.memory_space<vmem>>, %arg3: memref<1x128xf32, #tpu.memory_space<vmem>>, %arg4: memref<1x32x128xbf16, #tpu.memory_space<vmem>>, %arg5: memref<1x32x128xbf16, #tpu.memory_space<vmem>>, %arg6: memref<1x1x128xf32, #tpu.memory_space<vmem>>, %arg7: memref<32x128xbf16, #tpu.memory_space<vmem>>, %arg8: memref<1x128xf32, #tpu.memory_space<vmem>>, %arg9: memref<1x32x128xbf16, #tpu.memory_space<vmem>>, %arg10: memref<16x128xbf16, #tpu.memory_space<vmem>>) attributes {dimension_semantics = [#tpu.dimension_semantics<parallel>], iteration_bounds = array<i64: 1>, scalar_prefetch = 0 : i64, scratch_operands = 0 : i64, tpu.core_type = #tpu.core_type<tc>, window_params = [{transform_indices = @transform_0, window_bounds = array<i64: 16, 80>}, {pipeline_mode = #tpu.pipeline_mode<synchronous>, transform_indices = @transform_1, window_bounds = array<i64: 80, 128>}, {pipeline_mode = #tpu.pipeline_mode<synchronous>, transform_indices = @transform_2, window_bounds = array<i64: 1, 128>}, {pipeline_mode = #tpu.pipeline_mode<synchronous>, transform_indices = @transform_3, window_bounds = array<i64: 1, 32, 128>}, {pipeline_mode = #tpu.pipeline_mode<synchronous>, transform_indices = @transform_4, window_bounds = array<i64: 1, 32, 128>}, {pipeline_mode = #tpu.pipeline_mode<synchronous>, transform_indices = @transform_5, window_bounds = array<i64: 1, 1, 128>}, {pipeline_mode = #tpu.pipeline_mode<synchronous>, transform_indices = @transform_6, window_bounds = array<i64: 32, 128>}, {pipeline_mode = #tpu.pipeline_mode<synchronous>, transform_indices = @transform_7, window_bounds = array<i64: 1, 128>}, {pipeline_mode = #tpu.pipeline_mode<synchronous>, transform_indices = @transform_8, window_bounds = array<i64: 1, 32, 128>}, {transform_indices = @transform_9, window_bounds = array<i64: 16, 128>}]} {
    %c0 = arith.constant 0 : index
    %c0_0 = arith.constant 0 : index
    %0 = vector.load %arg1[%c0, %c0_0] : memref<16x80xbf16, #tpu.memory_space<vmem>>, vector<16x80xbf16>
    %c0_1 = arith.constant 0 : index
    %c0_2 = arith.constant 0 : index
    %1 = vector.load %arg2[%c0_1, %c0_2] : memref<80x128xbf16, #tpu.memory_space<vmem>>, vector<80x128xbf16>
    %cst = arith.constant dense<0.000000e+00> : vector<16x128xf32>
    %2 = tpu.matmul %0, %1, %cst {dimension_numbers = #tpu.dot_dimension_numbers<[1], [0], [0], [1], [0, 0, 1, 1], [], []>} : vector<16x80xbf16>, vector<80x128xbf16>, vector<16x128xf32> -> vector<16x128xf32>
    %c0_3 = arith.constant 0 : index
    %c0_4 = arith.constant 0 : index
    %3 = vector.load %arg3[%c0_3, %c0_4] : memref<1x128xf32, #tpu.memory_space<vmem>>, vector<1x128xf32>
    %4 = vector.broadcast %3 : vector<1x128xf32> to vector<16x128xf32>
    %5 = arith.addf %2, %4 : vector<16x128xf32>
    %6 = vector.extract_strided_slice %0 {offsets = [0, 16], sizes = [16, 32], strides = [1, 1]} : vector<16x80xbf16> to vector<16x32xbf16>
    %7 = arith.extf %6 : vector<16x32xbf16> to vector<16x32xf32>
    %8 = vector.extract_strided_slice %5 {offsets = [0, 0], sizes = [16, 64], strides = [1, 1]} : vector<16x128xf32> to vector<16x64xf32>
    %9 = arith.negf %8 : vector<16x64xf32>
    %10 = math.exp %9 : vector<16x64xf32>
    %cst_5 = arith.constant 1.000000e+00 : f32
    %11 = vector.broadcast %cst_5 : f32 to vector<16x64xf32>
    %12 = arith.addf %11, %10 : vector<16x64xf32>
    %13 = arith.divf %11, %12 : vector<16x64xf32>
    %14 = vector.extract_strided_slice %13 {offsets = [0, 0], sizes = [16, 32], strides = [1, 1]} : vector<16x64xf32> to vector<16x32xf32>
    %15 = vector.extract_strided_slice %13 {offsets = [0, 32], sizes = [16, 32], strides = [1, 1]} : vector<16x64xf32> to vector<16x32xf32>
    %16 = vector.extract_strided_slice %5 {offsets = [0, 64], sizes = [16, 32], strides = [1, 1]} : vector<16x128xf32> to vector<16x32xf32>
    %17 = vector.extract_strided_slice %5 {offsets = [0, 96], sizes = [16, 32], strides = [1, 1]} : vector<16x128xf32> to vector<16x32xf32>
    %18 = arith.mulf %14, %17 : vector<16x32xf32>
    %19 = arith.addf %16, %18 : vector<16x32xf32>
    %20 = math.tanh %19 : vector<16x32xf32>
    %cst_6 = arith.constant 1.000000e+00 : f32
    %21 = vector.broadcast %cst_6 : f32 to vector<16x32xf32>
    %22 = arith.subf %21, %15 : vector<16x32xf32>
    %23 = arith.mulf %22, %20 : vector<16x32xf32>
    %24 = arith.mulf %15, %7 : vector<16x32xf32>
    %25 = arith.addf %23, %24 : vector<16x32xf32>
    %26 = vector.extract_strided_slice %0 {offsets = [0, 48], sizes = [16, 32], strides = [1, 1]} : vector<16x80xbf16> to vector<16x32xbf16>
    %27 = arith.truncf %25 : vector<16x32xf32> to vector<16x32xbf16>
    %c0_7 = arith.constant 0 : index
    %c0_8 = arith.constant 0 : index
    %c0_9 = arith.constant 0 : index
    %28 = vector.load %arg4[%c0_7, %c0_8, %c0_9] : memref<1x32x128xbf16, #tpu.memory_space<vmem>>, vector<1x32x128xbf16>
    %29 = vector.shape_cast %28 : vector<1x32x128xbf16> to vector<32x128xbf16>
    %cst_10 = arith.constant dense<0.000000e+00> : vector<16x128xf32>
    %30 = tpu.matmul %27, %29, %cst_10 {dimension_numbers = #tpu.dot_dimension_numbers<[1], [0], [0], [1], [0, 0, 1, 1], [], []>} : vector<16x32xbf16>, vector<32x128xbf16>, vector<16x128xf32> -> vector<16x128xf32>
    %c0_11 = arith.constant 0 : index
    %c0_12 = arith.constant 0 : index
    %c0_13 = arith.constant 0 : index
    %31 = vector.load %arg5[%c0_11, %c0_12, %c0_13] : memref<1x32x128xbf16, #tpu.memory_space<vmem>>, vector<1x32x128xbf16>
    %32 = vector.shape_cast %31 : vector<1x32x128xbf16> to vector<32x128xbf16>
    %cst_14 = arith.constant dense<0.000000e+00> : vector<16x128xf32>
    %33 = tpu.matmul %26, %32, %cst_14 {dimension_numbers = #tpu.dot_dimension_numbers<[1], [0], [0], [1], [0, 0, 1, 1], [], []>} : vector<16x32xbf16>, vector<32x128xbf16>, vector<16x128xf32> -> vector<16x128xf32>
    %34 = arith.addf %30, %33 : vector<16x128xf32>
    %c0_15 = arith.constant 0 : index
    %c0_16 = arith.constant 0 : index
    %c0_17 = arith.constant 0 : index
    %35 = vector.load %arg6[%c0_15, %c0_16, %c0_17] : memref<1x1x128xf32, #tpu.memory_space<vmem>>, vector<1x1x128xf32>
    %36 = vector.shape_cast %35 : vector<1x1x128xf32> to vector<1x128xf32>
    %37 = vector.broadcast %36 : vector<1x128xf32> to vector<16x128xf32>
    %38 = arith.addf %34, %37 : vector<16x128xf32>
    %39 = arith.extf %26 : vector<16x32xbf16> to vector<16x32xf32>
    %40 = vector.extract_strided_slice %38 {offsets = [0, 0], sizes = [16, 64], strides = [1, 1]} : vector<16x128xf32> to vector<16x64xf32>
    %41 = arith.negf %40 : vector<16x64xf32>
    %42 = math.exp %41 : vector<16x64xf32>
    %cst_18 = arith.constant 1.000000e+00 : f32
    %43 = vector.broadcast %cst_18 : f32 to vector<16x64xf32>
    %44 = arith.addf %43, %42 : vector<16x64xf32>
    %45 = arith.divf %43, %44 : vector<16x64xf32>
    %46 = vector.extract_strided_slice %45 {offsets = [0, 0], sizes = [16, 32], strides = [1, 1]} : vector<16x64xf32> to vector<16x32xf32>
    %47 = vector.extract_strided_slice %45 {offsets = [0, 32], sizes = [16, 32], strides = [1, 1]} : vector<16x64xf32> to vector<16x32xf32>
    %48 = vector.extract_strided_slice %38 {offsets = [0, 64], sizes = [16, 32], strides = [1, 1]} : vector<16x128xf32> to vector<16x32xf32>
    %49 = vector.extract_strided_slice %38 {offsets = [0, 96], sizes = [16, 32], strides = [1, 1]} : vector<16x128xf32> to vector<16x32xf32>
    %50 = arith.mulf %46, %49 : vector<16x32xf32>
    %51 = arith.addf %48, %50 : vector<16x32xf32>
    %52 = math.tanh %51 : vector<16x32xf32>
    %cst_19 = arith.constant 1.000000e+00 : f32
    %53 = vector.broadcast %cst_19 : f32 to vector<16x32xf32>
    %54 = arith.subf %53, %47 : vector<16x32xf32>
    %55 = arith.mulf %54, %52 : vector<16x32xf32>
    %56 = arith.mulf %47, %39 : vector<16x32xf32>
    %57 = arith.addf %55, %56 : vector<16x32xf32>
    %58 = arith.truncf %57 : vector<16x32xf32> to vector<16x32xbf16>
    %c0_20 = arith.constant 0 : index
    %c0_21 = arith.constant 0 : index
    %59 = vector.load %arg7[%c0_20, %c0_21] : memref<32x128xbf16, #tpu.memory_space<vmem>>, vector<32x128xbf16>
    %cst_22 = arith.constant dense<0.000000e+00> : vector<16x128xf32>
    %60 = tpu.matmul %58, %59, %cst_22 {dimension_numbers = #tpu.dot_dimension_numbers<[1], [0], [0], [1], [0, 0, 1, 1], [], []>} : vector<16x32xbf16>, vector<32x128xbf16>, vector<16x128xf32> -> vector<16x128xf32>
    %c0_23 = arith.constant 0 : index
    %c0_24 = arith.constant 0 : index
    %61 = vector.load %arg8[%c0_23, %c0_24] : memref<1x128xf32, #tpu.memory_space<vmem>>, vector<1x128xf32>
    %62 = vector.broadcast %61 : vector<1x128xf32> to vector<16x128xf32>
    %63 = arith.addf %60, %62 : vector<16x128xf32>
    %64 = arith.truncf %25 : vector<16x32xf32> to vector<16x32xbf16>
    %c0_25 = arith.constant 0 : index
    %c0_26 = arith.constant 0 : index
    %c0_27 = arith.constant 0 : index
    %65 = vector.load %arg9[%c0_25, %c0_26, %c0_27] : memref<1x32x128xbf16, #tpu.memory_space<vmem>>, vector<1x32x128xbf16>
    %66 = vector.shape_cast %65 : vector<1x32x128xbf16> to vector<32x128xbf16>
    %cst_28 = arith.constant dense<0.000000e+00> : vector<16x128xf32>
    %67 = tpu.matmul %64, %66, %cst_28 {dimension_numbers = #tpu.dot_dimension_numbers<[1], [0], [0], [1], [0, 0, 1, 1], [], []>} : vector<16x32xbf16>, vector<32x128xbf16>, vector<16x128xf32> -> vector<16x128xf32>
    %68 = arith.addf %63, %67 : vector<16x128xf32>
    %69 = arith.truncf %68 : vector<16x128xf32> to vector<16x128xbf16>
    %c0_29 = arith.constant 0 : index
    %c0_30 = arith.constant 0 : index
    %70 = vector.load %arg10[%c0_29, %c0_30] : memref<16x128xbf16, #tpu.memory_space<vmem>>, vector<16x128xbf16>
    tpu.vector_store %arg10[%c0_29, %c0_30], %69 {strides = array<i32>} : memref<16x128xbf16, #tpu.memory_space<vmem>>, vector<16x128xbf16>,
    return
  }
  func.func @transform_0(%arg0: i32) -> (i32, i32) {
    %c0_i32 = arith.constant 0 : i32
    %c0_i32_0 = arith.constant 0 : i32
    return %arg0, %c0_i32 : i32, i32
  }
  func.func @transform_1(%arg0: i32) -> (i32, i32) {
    %c0_i32 = arith.constant 0 : i32
    %c0_i32_0 = arith.constant 0 : i32
    %c0_i32_1 = arith.constant 0 : i32
    return %c0_i32, %c0_i32_0 : i32, i32
  }
  func.func @transform_2(%arg0: i32) -> (i32, i32) {
    %c0_i32 = arith.constant 0 : i32
    %c0_i32_0 = arith.constant 0 : i32
    %c0_i32_1 = arith.constant 0 : i32
    return %c0_i32, %c0_i32_0 : i32, i32
  }
  func.func @transform_3(%arg0: i32) -> (i32, i32, i32) {
    %c0_i32 = arith.constant 0 : i32
    %c0_i32_0 = arith.constant 0 : i32
    %c0_i32_1 = arith.constant 0 : i32
    %c0_i32_2 = arith.constant 0 : i32
    return %c0_i32, %c0_i32_0, %c0_i32_1 : i32, i32, i32
  }
  func.func @transform_4(%arg0: i32) -> (i32, i32, i32) {
    %c0_i32 = arith.constant 0 : i32
    %c0_i32_0 = arith.constant 0 : i32
    %c0_i32_1 = arith.constant 0 : i32
    %c0_i32_2 = arith.constant 0 : i32
    return %c0_i32, %c0_i32_0, %c0_i32_1 : i32, i32, i32
  }
  func.func @transform_5(%arg0: i32) -> (i32, i32, i32) {
    %c0_i32 = arith.constant 0 : i32
    %c0_i32_0 = arith.constant 0 : i32
    %c0_i32_1 = arith.constant 0 : i32
    %c0_i32_2 = arith.constant 0 : i32
    return %c0_i32, %c0_i32_0, %c0_i32_1 : i32, i32, i32
  }
  func.func @transform_6(%arg0: i32) -> (i32, i32) {
    %c0_i32 = arith.constant 0 : i32
    %c0_i32_0 = arith.constant 0 : i32
    %c0_i32_1 = arith.constant 0 : i32
    return %c0_i32, %c0_i32_0 : i32, i32
  }
  func.func @transform_7(%arg0: i32) -> (i32, i32) {
    %c0_i32 = arith.constant 0 : i32
    %c0_i32_0 = arith.constant 0 : i32
    %c0_i32_1 = arith.constant 0 : i32
    return %c0_i32, %c0_i32_0 : i32, i32
  }
  func.func @transform_8(%arg0: i32) -> (i32, i32, i32) {
    %c0_i32 = arith.constant 0 : i32
    %c0_i32_0 = arith.constant 0 : i32
    %c0_i32_1 = arith.constant 0 : i32
    %c0_i32_2 = arith.constant 0 : i32
    return %c0_i32, %c0_i32_0, %c0_i32_1 : i32, i32, i32
  }
  func.func @transform_9(%arg0: i32) -> (i32, i32) {
    %c0_i32 = arith.constant 0 : i32
    %c0_i32_0 = arith.constant 0 : i32
    return %arg0, %c0_i32 : i32, i32
  }
}

</mosaic_0001>

<bundles_post_ra>
// kernel: tpu_custom_call.1
= control target key start
LH: loop header
LB: loop body
LE: loop exit
PB: predicated region body
PF: predicated region fallthrough
CT: control target
= control target key end

     0   :  { %14 = vsyncpa [#allocation3], 0  ;;  %s1109_s0 = inlined_call_operand.hbm [shape: bf16[16,80], index: 0, kind: input, shape index: {}]   ;;  %s1110_s1 = inlined_call_operand.hbm [shape: bf16[80,128], index: 1, kind: input, shape index: {}]   ;;  %s1111_s2 = inlined_call_operand.vmem [shape: f32[1,128], index: 2, kind: input, shape index: {}]   ;;  %s1112_s3 = inlined_call_operand.hbm [shape: bf16[1,32,128], index: 3, kind: input, shape index: {}]   ;;  %s1113_s4 = inlined_call_operand.hbm [shape: bf16[1,32,128], index: 4, kind: input, shape index: {}]   ;;  %s1114_s5 = inlined_call_operand.vmem [shape: f32[1,1,128], index: 5, kind: input, shape index: {}]   ;;  %s1115_s6 = inlined_call_operand.hbm [shape: bf16[32,128], index: 6, kind: input, shape index: {}]   ;;  %s1116_s7 = inlined_call_operand.vmem [shape: f32[1,128], index: 7, kind: input, shape index: {}]   ;;  %s1117_s8 = inlined_call_operand.hbm [shape: bf16[1,32,128], index: 8, kind: input, shape index: {}]   ;;  %s1118_s9 = inlined_call_operand.hbm [shape: bf16[16,128], index: 9, kind: output, shape index: {}]  }
   0x1   :  { %15 = vsyncpa [#allocation6], 0 }
   0x2   :  { %16 = vsyncpa [#allocation9], 0 }
   0x3   :  { %17 = vsyncpa [#allocation12], 0 }
   0x4   :  { %18 = vsyncpa [#allocation4], 0  ;;  %s941_s30 = smov [#allocation5]   ;;  %s942_s11 = smov [#allocation8]  }
   0x5   :  { %s36_s10 = sshll.u32 %s941_s30, 4  ;;  %s62_s12 = sshll.u32 %s942_s11, 4  ;;  %s37_s10 = int_to_ptr.vmem [resolvable:$true] %s36_s10  ;;  %s63_s12 = int_to_ptr.vmem [resolvable:$true] %s62_s12 }
   0x6   :  { %s799_s13 = scalar_lea.vmem %s37_s10, 640  ;;  %p804_p1 = scmp.lt.s32.totalorder %s37_s10, %s37_s10 }
   0x7   :  { %p800_p0 = scmp.ne.s32.totalorder %s37_s10, %s799_s13  ;;  %p805_p2 = scmp.lt.s32.totalorder %s799_s13, %s799_s13 }
   0x9   :  { %p806_p3 = por %p805_p2, %p804_p1 }
   0xb   :  { %p807_p4 = pnand %p806_p3, %p800_p0 }
   0xd   :  { %810 = shalt.err (!%p807_p4)
}
   0xe   :  { %s943_s14 = smov 64   ;;  %s944_s15 = smov 4  }
   0xf   :  { %42 = dma.hbm_to_vmem [thread:$0]  %s1110_s1, 640, %s37_s10, [#allocation6], %s943_s14, %s943_s14, %s944_s15  }
  0x10   :  { %s819_s18 = scalar_lea.vmem %s63_s12, 256  ;;  %p824_p6 = scmp.lt.s32.totalorder %s63_s12, %s63_s12 }
  0x11   :  { %p820_p5 = scmp.ne.s32.totalorder %s63_s12, %s819_s18  ;;  %p825_p7 = scmp.lt.s32.totalorder %s819_s18, %s819_s18 }
  0x13   :  { %p826_p8 = por %p825_p7, %p824_p6 }
  0x15   :  { %p827_p9 = pnand %p826_p8, %p820_p5 }
  0x17   :  { %830 = shalt.err (!%p827_p9)
}
  0x18   :  { %68 = dma.hbm_to_vmem [thread:$0]  %s1113_s4, 256, %s63_s12, [#allocation9], %s943_s14, %s943_s14, %s944_s15  }
  0x19   :  { %s945_s21 = smov [#allocation2]   ;;  %s946_s23 = smov [#allocation7]  }
  0x1a   :  { %s24_s22 = sshll.u32 %s945_s21, 4  ;;  %s50_s24 = sshll.u32 %s946_s23, 4  ;;  %s25_s22 = int_to_ptr.vmem [resolvable:$true] %s24_s22  ;;  %s51_s24 = int_to_ptr.vmem [resolvable:$true] %s50_s24 }
  0x1b   :  { %s839_s1 = scalar_lea.vmem %s25_s22, 128  ;;  %p844_p11 = scmp.lt.s32.totalorder %s25_s22, %s25_s22 }
  0x1c   :  { %p840_p10 = scmp.ne.s32.totalorder %s25_s22, %s839_s1  ;;  %p845_p12 = scmp.lt.s32.totalorder %s839_s1, %s839_s1 }
  0x1e   :  { %p846_p13 = por %p845_p12, %p844_p11 }
  0x20   :  { %p847_p0 = pnand %p846_p13, %p840_p10 }
  0x22   :  { %850 = shalt.err (!%p847_p0)
}
  0x23   :  { %30 = dma.hbm_to_vmem [thread:$0]  %s1109_s0, 128, %s25_s22, [#allocation3], %s943_s14, %s943_s14, %s944_s15  }
  0x24   :  { %s859_s4 = scalar_lea.vmem %s51_s24, 256  ;;  %p864_p2 = scmp.lt.s32.totalorder %s51_s24, %s51_s24 }
  0x25   :  { %p860_p1 = scmp.ne.s32.totalorder %s51_s24, %s859_s4  ;;  %p865_p3 = scmp.lt.s32.totalorder %s859_s4, %s859_s4 }
  0x27   :  { %p866_p4 = por %p865_p3, %p864_p2 }
  0x29   :  { %p867_p5 = pnand %p866_p4, %p860_p1 }
  0x2b   :  { %870 = shalt.err (!%p867_p5)
}
  0x2c   :  { %56 = dma.hbm_to_vmem [thread:$0]  %s1112_s3, 256, %s51_s24, [#allocation6], %s943_s14, %s943_s14, %s944_s15  }
  0x2d   :  { %s947_s29 = smov [#allocation10]   ;;  %s948_s10 = smov [#allocation11]  }
  0x2e   :  { %s76_s30 = sshll.u32 %s947_s29, 4  ;;  %s90_s11 = sshll.u32 %s948_s10, 4  ;;  %s77_s30 = int_to_ptr.vmem [resolvable:$true] %s76_s30  ;;  %s91_s11 = int_to_ptr.vmem [resolvable:$true] %s90_s11 }
  0x2f   :  { %s879_s0 = scalar_lea.vmem %s77_s30, 256  ;;  %p884_p7 = scmp.lt.s32.totalorder %s77_s30, %s77_s30 }
  0x30   :  { %p880_p6 = scmp.ne.s32.totalorder %s77_s30, %s879_s0  ;;  %p885_p8 = scmp.lt.s32.totalorder %s879_s0, %s879_s0 }
  0x32   :  { %p886_p9 = por %p885_p8, %p884_p7 }
  0x34   :  { %p887_p10 = pnand %p886_p9, %p880_p6 }
  0x36   :  { %890 = shalt.err (!%p887_p10)
}
  0x37   :  { %82 = dma.hbm_to_vmem [thread:$0]  %s1115_s6, 256, %s77_s30, [#allocation9], %s943_s14, %s943_s14, %s944_s15  }
  0x38   :  { %s899_s3 = scalar_lea.vmem %s91_s11, 256  ;;  %p904_p12 = scmp.lt.s32.totalorder %s91_s11, %s91_s11 }
  0x39   :  { %p900_p11 = scmp.ne.s32.totalorder %s91_s11, %s899_s3  ;;  %p905_p13 = scmp.lt.s32.totalorder %s899_s3, %s899_s3 }
  0x3b   :  { %p906_p0 = por %p905_p13, %p904_p12 }
  0x3d   :  { %p907_p1 = pnand %p906_p0, %p900_p11 }
  0x3f   :  { %910 = shalt.err (!%p907_p1)
}
  0x40   :  { %96 = dma.hbm_to_vmem [thread:$0]  %s1117_s8, 256, %s91_s11, [#allocation12], %s943_s14, %s943_s14, %s944_s15  }
  0x41   :  { %931 = dma.done.wait [#allocation3], 128  }
  0x42   :  { %932 = vsyncadd [#allocation3], 4294967168 }
  0x43   :  { %933 = dma.done.wait [#allocation6], 896  }
  0x44   :  { %934 = vsyncadd [#allocation6], 4294966400 }
  0x45   :  { %935 = dma.done.wait [#allocation9], 512  }
  0x46   :  { %936 = vsyncadd [#allocation9], 4294966784 }
  0x47   :  { %937 = dma.done.wait [#allocation12], 256  }
  0x48   :  { %938 = vsyncadd [#allocation12], 4294967040  ;;  %v949_v0 = vmov 0.0   ;;  %vm950_vm0 = vmmov 0   ;;  %v752_v1 = vld [vmem:[#allocation5 + $0x20] sm:$0xff]   ;;  %v753_v2 = vld [vmem:[#allocation5 + $0x18] sm:$0xff]  }
  0x49   :  { %680 = vmatprep.subr.bf16.mxu0 %v949_v0  ;;  %690 = vmatprep.mubr.msk.bf16.mxu0 %vm950_vm0, %v949_v0  ;;  %v754_v3 = vld [vmem:[#allocation5 + $0x10] sm:$0xff]   ;;  %v755_v4 = vld [vmem:[#allocation5 + $0x8] sm:$0xff]   ;;  %v756_v5 = vld [vmem:[#allocation5] sm:$0xff]   ;;  %vm170_vm1 = vcmask 654336   ;;  %s951_s18 = smov 32   ;;  %s953_s19 = smov 16  }
  0x4a   :  { %694 = vmatprep.subr.bf16.mxu1 %v949_v0  ;;  %698 = vmatprep.mubr.msk.bf16.mxu1 %vm950_vm0, %v949_v0  ;;  %v116_v6 = vld [vmem:[#allocation2] sm:$0xff]   ;;  %v758_v33 = vld [vmem:[#allocation8 + $0x8] sm:$0xff]   ;;  %s954_s20 = smov 80   ;;  %vm298_vm2 = vcmask 261120   ;;  %v760_v46 = vld [vmem:[#allocation7 + $0x8] sm:$0xff]   ;;  %s956_s1 = smov [#allocation13]  }
  0x4b   :  { %681 = vmatpush3.bf16.msra.mxu0 %v752_v1  ;;  %v627_v7 = vld [vmem:[%s1111_s2] ss:$0 sm:$0xff]  ;;  %v215_v30 = vunpack.c.l.bf16 %v116_v6  ;;  %v216_v31 = vunpack.c.h.bf16 %v116_v6  ;;  %s952_s2 = smov 96   ;;  %v761_v35 = vld [vmem:[#allocation11 + $0x8] sm:$0xff]   ;;  %695 = vmatpush3.bf16.msra.mxu1 %v758_v33  ;;  %v762_v54 = vld [vmem:[#allocation7] sm:$0xff]   ;;  %s612_s25 = sshll.u32 %s956_s1, 4  ;;  %s613_s25 = int_to_ptr.vmem [resolvable:$true] %s612_s25 }
  0x4c   :  { %682 = vmatprep.subr.bf16.mxu0 %v949_v0  ;;  %v759_v36 = vld [vmem:[#allocation8] sm:$0xff]   ;;  %696 = vmatprep.subr.bf16.mxu1 %v949_v0  ;;  %s911_s26 = scalar_lea.vmem %s613_s25, 128  ;;  %p916_p3 = scmp.lt.s32.totalorder %s613_s25, %s613_s25 }
  0x4d   :  { %v1064_v34 = vpack.i.bf16 %v216_v31, %v215_v30  ;;  %v763_v37 = vld [vmem:[#allocation11] sm:$0xff]   ;;  %p912_p2 = scmp.ne.s32.totalorder %s613_s25, %s911_s26  ;;  %p917_p4 = scmp.lt.s32.totalorder %s911_s26, %s911_s26 }
  0x4e   :  { %v643_v62 = vld [vmem:[%s1114_s5] ss:$0 sm:$0xff]  ;;  %s955_s5 = smov 112  }
  0x4f   :  { %683 = vmatpush3.bf16.msra.mxu0 %v753_v2  ;;  %697 = vmatpush3.bf16.msra.mxu1 %v759_v36  ;;  %p918_p5 = por %p917_p4, %p916_p3 }
  0x50   :  { %684 = vmatprep.subr.bf16.mxu0 %v949_v0  ;;  %702 = vmatprep.subr.bf16.mxu1 %v949_v0 }
  0x51   :  { %p919_p6 = pnand %p918_p5, %p912_p2 }
  0x53   :  { %685 = vmatpush3.bf16.msra.mxu0 %v754_v3 }
  0x54   :  { %686 = vmatprep.subr.bf16.mxu0 %v949_v0 }
  0x57   :  { %687 = vmatpush3.bf16.msra.mxu0 %v755_v4 }
  0x58   :  { %688 = vmatprep.subr.bf16.mxu0 %v949_v0 }
  0x5b   :  { %689 = vmatpush3.bf16.msra.mxu0 %v756_v5 }
  0x5c   :  { %718 = vmatprep.subr.bf16.mxu0 %v949_v0 }
  0x5e   :  { %691 = vmatmul.mubr.msk.bf16.vlgmr.msra.gmra.mxu0 %vm170_vm1, %v116_v6 }
  0x5f   :  { %722 = vmatprep.mubr.msk.bf16.mxu0 %vm950_vm0, %v949_v0  ;;  %719 = vmatpush3.bf16.msra.mxu0 %v761_v35 }
  0x60   :  { %720 = vmatprep.subr.bf16.mxu0 %v949_v0 }
  0x63   :  { %721 = vmatpush3.bf16.msra.mxu0 %v763_v37 }
 0x11e   :  { %v208_v8 = vpop.f32.mrf.mxu0 }
 0x11f   :  { %v209_v9 = vadd.f32 %v627_v7, %v208_v8 }
 0x120   :  { %v692_v10 = vpop.f32.mrf.mxu0 }
 0x121   :  { %231 = vrot.lane.b32.xlu0 %v209_v9, %s951_s18  ;;  %v635_v14 = vmul.f32 -1.442695, %v209_v9 }
 0x122   :  { %v211_v11 = vpop.f32.mrf.mxu0 }
 0x123   :  { %v212_v12 = vadd.f32 %v627_v7, %v211_v11  ;;  %767 = vpow2.f32 %v635_v14 }
 0x124   :  { %v693_v13 = vpop.f32.mrf.mxu0 }
 0x125   :  { %233 = vrot.lane.b32.xlu0 %v212_v12, %s951_s18  ;;  %v636_v15 = vmul.f32 -1.442695, %v212_v12 }
 0x127   :  { %769 = vpow2.f32 %v636_v15 }
 0x130   :  { %v768_v16 = vpop.eup %767 }
 0x131   :  { %v223_v17 = vadd.f32 1.0, %v768_v16 }
 0x133   :  { %771 = vrcp.f32 %v223_v17 }
 0x134   :  { %v770_v18 = vpop.eup %769 }
 0x135   :  { %v224_v19 = vadd.f32 1.0, %v770_v18 }
 0x137   :  { %773 = vrcp.f32 %v224_v19 }
 0x140   :  { %v772_v20 = vpop.eup %771 }
 0x141   :  { %v251_v42 = vsub.f32 1.0, %v772_v20 }
 0x144   :  { %v774_v23 = vpop.eup %773 }
 0x145   :  { %v252_v45 = vsub.f32 1.0, %v774_v23 }
 0x193   :  { %v232_v21 = vpop.permute.xlu0 %231 }
 0x194   :  { %v237_v22 = vmul.f32 %v772_v20, %v232_v21 }
 0x196   :  { %241 = vrot.lane.b32.xlu1 %v237_v22, %s943_s14 }
 0x197   :  { %v234_v24 = vpop.permute.xlu0 %233 }
 0x198   :  { %v238_v25 = vmul.f32 %v774_v23, %v234_v24 }
 0x19a   :  { %243 = vrot.lane.b32.xlu1 %v238_v25, %s943_s14 }
 0x208   :  { %v242_v26 = vpop.permute.xlu1 %241 }
 0x209   :  { %v247_v27 = vadd.f32 %v242_v26, %v209_v9 }
 0x20b   :  { %775 = vtanh.f32 %v247_v27 }
 0x20c   :  { %v244_v28 = vpop.permute.xlu1 %243 }
 0x20d   :  { %v248_v29 = vadd.f32 %v244_v28, %v212_v12  ;;  %v764_v28 = vld [vmem:[#allocation10 + $0x8] sm:$0xff]  }
 0x20f   :  { %777 = vtanh.f32 %v248_v29  ;;  %v765_v29 = vld [vmem:[#allocation10] sm:$0xff]  }
 0x218   :  { %v776_v32 = vpop.eup %775 }
 0x219   :  { %255 = vrot.lane.b32.xlu0 %v776_v32, %s952_s2 }
 0x21c   :  { %v778_v38 = vpop.eup %777 }
 0x21d   :  { %743 = vrot.lane.b32.xlu0 %v1064_v34, %s953_s19  ;;  %257 = vrot.lane.b32.xlu1 %v778_v38, %s952_s2 }
 0x221   :  { %284 = vrot.lane.b32.xlu1 %v116_v6, %s954_s20 }
 0x28b   :  { %v256_v39 = vpop.permute.xlu0 %255 }
 0x28c   :  { %v261_v47 = vmul.f32 %v256_v39, %v251_v42 }
 0x28f   :  { %v744_v40 = vpop.permute.xlu0 %743  ;;  %v258_v41 = vpop.permute.xlu1 %257 }
 0x290   :  { %v746_v43 = vunpack.i.h.bf16 %v744_v40  ;;  %v745_v44 = vunpack.i.l.bf16 %v744_v40  ;;  %v262_v50 = vmul.f32 %v258_v41, %v252_v45  ;;  %v646_v45 = vld [vmem:[%s1116_s7] ss:$0 sm:$0xff] }
 0x292   :  { %v271_v48 = vmul.f32 %v772_v20, %v745_v44  ;;  %v272_v49 = vmul.f32 %v774_v23, %v746_v43 }
 0x293   :  { %v285_v51 = vpop.permute.xlu1 %284 }
 0x294   :  { %v273_v52 = vadd.f32 %v271_v48, %v261_v47  ;;  %v274_v53 = vadd.f32 %v272_v49, %v262_v50  ;;  %699 = vmatmul.mubr.msk.bf16.vlgmr.msra.gmra.mxu1 %vm298_vm2, %v285_v51 }
 0x295   :  { %703 = vmatpush3.bf16.msra.mxu1 %v760_v46  ;;  %706 = vmatprep.mubr.msk.bf16.mxu1 %vm950_vm0, %v949_v0 }
 0x296   :  { %v275_v55 = vpack.c.bf16 %v274_v53, %v273_v52  ;;  %704 = vmatprep.subr.bf16.mxu1 %v949_v0 }
 0x298   :  { %344 = vrot.lane.b32.xlu0 %v275_v55, %s952_s2 }
 0x299   :  { %705 = vmatpush3.bf16.msra.mxu1 %v762_v54 }
 0x29a   :  { %710 = vmatprep.subr.bf16.mxu1 %v949_v0 }
 0x30a   :  { %v345_v56 = vpop.permute.xlu0 %344 }
 0x30b   :  { %707 = vmatmul.mubr.msk.bf16.vlgmr.msra.gmra.mxu1 %vm298_vm2, %v345_v56  ;;  %723 = vmatmul.mubr.msk.bf16.vlgmr.msra.gmra.mxu0 %vm298_vm2, %v345_v56 }
 0x30c   :  { %714 = vmatprep.mubr.msk.bf16.mxu1 %vm950_vm0, %v949_v0  ;;  %711 = vmatpush3.bf16.msra.mxu1 %v764_v28 }
 0x30d   :  { %712 = vmatprep.subr.bf16.mxu1 %v949_v0 }
 0x310   :  { %713 = vmatpush3.bf16.msra.mxu1 %v765_v29 }
 0x354   :  { %v336_v57 = vpop.f32.mrf.mxu1 }
 0x356   :  { %v700_v58 = vpop.f32.mrf.mxu1 }
 0x358   :  { %v339_v59 = vpop.f32.mrf.mxu1 }
 0x35a   :  { %v701_v60 = vpop.f32.mrf.mxu1 }
 0x3cb   :  { %v395_v61 = vpop.f32.mrf.mxu1  ;;  %v1084_v63 = vpop.f32.mrf.mxu0 }
 0x3cc   :  { %v396_v1 = vadd.f32 %v395_v61, %v336_v57 }
 0x3cd   :  { %v708_v2 = vpop.f32.mrf.mxu1  ;;  %v724_v3 = vpop.f32.mrf.mxu0 }
 0x3ce   :  { %v409_v4 = vadd.f32 %v643_v62, %v396_v1 }
 0x3cf   :  { %v398_v5 = vpop.f32.mrf.mxu1  ;;  %v1086_v6 = vpop.f32.mrf.mxu0 }
 0x3d0   :  { %v399_v7 = vadd.f32 %v398_v5, %v339_v59  ;;  %425 = vrot.lane.b32.xlu1 %v409_v4, %s951_s18  ;;  %v644_v11 = vmul.f32 -1.442695, %v409_v4 }
 0x3d1   :  { %v709_v8 = vpop.f32.mrf.mxu1  ;;  %v725_v9 = vpop.f32.mrf.mxu0 }
 0x3d2   :  { %v410_v10 = vadd.f32 %v643_v62, %v399_v7  ;;  %779 = vpow2.f32 %v644_v11 }
 0x3d4   :  { %427 = vrot.lane.b32.xlu0 %v410_v10, %s951_s18  ;;  %v645_v12 = vmul.f32 -1.442695, %v410_v10 }
 0x3d6   :  { %781 = vpow2.f32 %v645_v12 }
 0x3df   :  { %v780_v13 = vpop.eup %779 }
 0x3e0   :  { %v417_v14 = vadd.f32 1.0, %v780_v13 }
 0x3e2   :  { %783 = vrcp.f32 %v417_v14 }
 0x3e3   :  { %v782_v15 = vpop.eup %781 }
 0x3e4   :  { %v418_v16 = vadd.f32 1.0, %v782_v15 }
 0x3e6   :  { %785 = vrcp.f32 %v418_v16 }
 0x3ef   :  { %v784_v17 = vpop.eup %783 }
 0x3f0   :  { %v445_v35 = vsub.f32 1.0, %v784_v17 }
 0x3f3   :  { %v786_v20 = vpop.eup %785 }
 0x3f4   :  { %v446_v38 = vsub.f32 1.0, %v786_v20 }
 0x442   :  { %v426_v18 = vpop.permute.xlu1 %425 }
 0x443   :  { %v431_v19 = vmul.f32 %v784_v17, %v426_v18 }
 0x445   :  { %435 = vrot.lane.b32.xlu1 %v431_v19, %s943_s14 }
 0x446   :  { %v428_v21 = vpop.permute.xlu0 %427 }
 0x447   :  { %v432_v22 = vmul.f32 %v786_v20, %v428_v21 }
 0x449   :  { %437 = vrot.lane.b32.xlu0 %v432_v22, %s943_s14 }
 0x4b7   :  { %v436_v23 = vpop.permute.xlu1 %435 }
 0x4b8   :  { %v441_v24 = vadd.f32 %v436_v23, %v409_v4 }
 0x4ba   :  { %787 = vtanh.f32 %v441_v24 }
 0x4bb   :  { %v438_v25 = vpop.permute.xlu0 %437 }
 0x4bc   :  { %v442_v26 = vadd.f32 %v438_v25, %v410_v10 }
 0x4be   :  { %789 = vtanh.f32 %v442_v26 }
 0x4c7   :  { %v788_v27 = vpop.eup %787 }
 0x4c8   :  { %449 = vrot.lane.b32.xlu1 %v788_v27, %s952_s2 }
 0x4cb   :  { %v790_v30 = vpop.eup %789 }
 0x4cc   :  { %748 = vrot.lane.b32.xlu1 %v1064_v34, %s955_s5  ;;  %451 = vrot.lane.b32.xlu0 %v790_v30, %s952_s2 }
 0x53a   :  { %v450_v31 = vpop.permute.xlu1 %449 }
 0x53b   :  { %v455_v39 = vmul.f32 %v450_v31, %v445_v35 }
 0x53e   :  { %v749_v32 = vpop.permute.xlu1 %748  ;;  %v452_v33 = vpop.permute.xlu0 %451 }
 0x53f   :  { %v751_v36 = vunpack.i.h.bf16 %v749_v32  ;;  %v750_v37 = vunpack.i.l.bf16 %v749_v32  ;;  %v456_v42 = vmul.f32 %v452_v33, %v446_v38 }
 0x541   :  { %v463_v40 = vmul.f32 %v784_v17, %v750_v37  ;;  %v464_v41 = vmul.f32 %v786_v20, %v751_v36 }
 0x543   :  { %v465_v43 = vadd.f32 %v463_v40, %v455_v39  ;;  %v466_v0 = vadd.f32 %v464_v41, %v456_v42 }
 0x545   :  { %v467_v44 = vpack.c.bf16 %v466_v0, %v465_v43 }
 0x547   :  { %480 = vrot.lane.b32.xlu0 %v467_v44, %s952_s2 }
 0x5b9   :  { %v481_v34 = vpop.permute.xlu0 %480 }
 0x5ba   :  { %715 = vmatmul.mubr.msk.bf16.vlgmr.msra.gmra.mxu1 %vm298_vm2, %v481_v34 }
 0x67a   :  { %v531_v46 = vpop.f32.mrf.mxu1 }
 0x67b   :  { %v532_v48 = vadd.f32 %v646_v45, %v531_v46 }
 0x67c   :  { %v716_v47 = vpop.f32.mrf.mxu1 }
 0x67d   :  { %v595_v52 = vadd.f32 %v1084_v63, %v532_v48 }
 0x67e   :  { %v534_v49 = vpop.f32.mrf.mxu1 }
 0x67f   :  { %v535_v50 = vadd.f32 %v646_v45, %v534_v49 }
 0x680   :  { %v717_v51 = vpop.f32.mrf.mxu1 }
 0x681   :  { %v596_v53 = vadd.f32 %v1086_v6, %v535_v50 }
 0x683   :  { %v660_v54 = vpack.c.bf16 %v596_v53, %v595_v52 }
 0x685   :  { %661 = vst [vmem:[#allocation13] sm:$0xff] %v660_v54  }
 0x686   :  { %922 = shalt.err (!%p919_p6)
}
 0x687   :  { %618 = dma.vmem_to_hbm [thread:$0]  %s613_s25, 128, %s1118_s9, [#allocation4], %s943_s14, %s943_s14, %s944_s15  }
 0x688   :  { %939 = dma.done.wait [#allocation4], 128  }
 0x689   :  { %940 = vsyncadd [#allocation4], 4294967168 }
 0x68a   :  { %622 = vsyncpa [#allocation3], 1 }
 0x68b   :  { %623 = vsyncpa [#allocation6], 1 }
 0x68c   :  { %624 = vsyncpa [#allocation9], 1 }
 0x68d   :  { %625 = vsyncpa [#allocation12], 1 }
 0x68e   :  { %626 = vsyncpa [#allocation4], 1 }

</bundles_post_ra>
